<compile_context>
chip_gen: v5e
topology: v5e:2x2
jax: 0.10.0
libtpu: 0.0.40
codegen_flags: <defaults>
</compile_context>

<pallas_src>
import math

import jax
import jax.numpy as jnp
from jax import lax
from jax.experimental import pallas as pl
from jax.experimental.pallas import tpu as pltpu


# sigmoid(x) > 0.6  <=>  x > log(0.6 / 0.4) = log(1.5)
_LOGIT_THR = math.log(1.5)


def _round_up(x, m):
    return (x + m - 1) // m * m


def _device_config():
    """(per-block byte budget, vmem_limit_bytes, default num_parallel)."""
    try:
        kind = jax.devices()[0].device_kind.lower()
    except Exception:  # pragma: no cover - defensive
        kind = ""
    if "v7" in kind:
        # v7x: 64 MiB VMEM per TensorCore, 2 TCs per chip.
        return 16 << 20, 56 << 20, 2
    if "v6" in kind or "v5e" in kind or "v5 lite" in kind or "v5lite" in kind:
        # v5e / v6e: 128 MiB physical VMEM, single TensorCore.
        return 12 << 20, 96 << 20, 1
    # Older / unknown generations: conservative budgets. Megacore chips
    # (v4 / v5p) still benefit from the 2-way leading split.
    two_tc = ("v4" in kind) or ("v5p" in kind) or ("v5 p" in kind)
    return 8 << 20, 48 << 20, 2 if two_tc else 1


def _pick_tile_v(N, C, D, V, budget_bytes):
    """Largest lane tile (multiple of 128) whose (N,C,D,tile) block fits the
    per-block budget and whose zero-padding of V wastes <= 1/8 extra traffic."""
    per_lane = N * C * D * 4
    v128 = _round_up(V, 128)
    for cand in (32768, 16384, 8192, 4096, 2048, 1024, 512, 256):
        if cand > v128:
            continue
        if per_lane * cand > budget_bytes:
            continue
        if (_round_up(V, cand) - V) * 8 <= V:
            return cand
    return 128


def _make_kernel(N, C, D, tile_v, tiles_per_p, v_true, needs_mask):
    def kernel(x_ref, w_ref, b_ref, o_ref, acc_ref):
        # x_ref: (N, C, D, tile_v) f32 VMEM
        # w_ref: (C,) f32 SMEM, b_ref: (1,) f32 SMEM
        # o_ref: (1, N, N) f32 (resident across the V axis)
        # acc_ref: (N, N) f32 VMEM scratch
        @pl.when(pl.program_id(1) == 0)
        def _init():
            acc_ref[...] = jnp.zeros_like(acc_ref)

        # --- 1x1x1 conv: tiny static channel MAC, tree-summed (VPU) ---
        parts = [x_ref[:, c, :, :] * w_ref[c] for c in range(C)]
        while len(parts) > 1:
            nxt = [parts[i] + parts[i + 1] for i in range(0, len(parts) - 1, 2)]
            if len(parts) % 2:
                nxt.append(parts[-1])
            parts = nxt
        logits = parts[0] + b_ref[0]                       # (N, D, tile_v)

        # --- scatter_(1, out_max, 1) with out_max in {0,1}, on logits ---
        # sigmoid is monotone, so threshold logits against log(1.5).
        sel1 = (jnp.max(logits, axis=1) > _LOGIT_THR).astype(jnp.float32)   # (N, tv)
        sel0 = (jnp.min(logits, axis=1) <= _LOGIT_THR).astype(jnp.float32)  # (N, tv)

        if needs_mask:  # static: only when V was zero-padded to a tile multiple
            v_tile = pl.program_id(0) * tiles_per_p + pl.program_id(1)
            lane = lax.broadcasted_iota(jnp.int32, (N, tile_v), 1)
            valid = (v_tile * tile_v + lane) < v_true
            sel1 = jnp.where(valid, sel1, 0.0)
            sel0 = jnp.where(valid, sel0, 0.0)

        # sigmoid only on the two d-slices that reach the output (EUP relief).
        mo0 = jax.nn.sigmoid(logits[:, 0, :])              # (N, tile_v)
        mo1 = jax.nn.sigmoid(logits[:, 1, :])              # (N, tile_v)

        # --- out[i,j] += Σ_v mo0[i,v]·sel0[j,v] + mo1[i,v]·sel1[j,v] (MXU) ---
        dn = (((1,), (1,)), ((), ()))
        partial = lax.dot_general(mo0, sel0, dn, preferred_element_type=jnp.float32)
        partial = partial + lax.dot_general(mo1, sel1, dn,
                                            preferred_element_type=jnp.float32)
        acc_ref[...] += partial

        @pl.when(pl.program_id(1) == pl.num_programs(1) - 1)
        def _store():
            o_ref[...] = acc_ref[...][None]

    return kernel


def model_wrapper_forward(x_ncdhw, conv_w, conv_b, *, tile_v=None,
                          num_parallel=None, block_budget=None,
                          vmem_limit=None):
    """x_ncdhw: (N, C, D, H, W) f32 (PyTorch layout). Returns (N, N) f32."""
    N, C, D, H, W = x_ncdhw.shape
    assert D >= 2, "scatter with indices in {0,1} requires D >= 2"
    V = H * W

    dflt_budget, dflt_vmem, dflt_parallel = _device_config()
    if block_budget is None:
        block_budget = dflt_budget
    if vmem_limit is None:
        vmem_limit = dflt_vmem

    # (N, C, D, H*W) is a pure reshape of NCDHW: no transpose, no HBM round trip.
    x_k = x_ncdhw.reshape(N, C, D, V).astype(jnp.float32)
    w = conv_w.reshape(C).astype(jnp.float32)
    b = conv_b.reshape(1).astype(jnp.float32)

    if tile_v is None:
        tile_v = _pick_tile_v(N, C, D, V, block_budget)
    v_pad = _round_up(V, tile_v)
    if v_pad != V:
        # Pad V with zeros; the tail lanes are masked out of sel0/sel1 in-kernel.
        x_k = jnp.pad(x_k, ((0, 0), (0, 0), (0, 0), (0, v_pad - V)))
    num_tiles = v_pad // tile_v

    if num_parallel is None:
        num_parallel = dflt_parallel
    if num_parallel > num_tiles or num_tiles % num_parallel != 0:
        num_parallel = 1
    tiles_per_p = num_tiles // num_parallel

    kernel = _make_kernel(N, C, D, tile_v, tiles_per_p, V, v_pad != V)

    cost = pl.CostEstimate(
        flops=2 * N * C * D * v_pad + 2 * 2 * N * N * v_pad,
        transcendentals=2 * N * v_pad,
        bytes_accessed=N * C * D * v_pad * 4 + num_parallel * N * N * 4,
    )

    partials = pl.pallas_call(
        kernel,
        grid=(num_parallel, tiles_per_p),
        in_specs=[
            pl.BlockSpec((N, C, D, tile_v),
                         lambda p, v: (0, 0, 0, p * tiles_per_p + v)),
            pl.BlockSpec(memory_space=pltpu.MemorySpace.SMEM),
            pl.BlockSpec(memory_space=pltpu.MemorySpace.SMEM),
        ],
        out_specs=pl.BlockSpec((1, N, N), lambda p, v: (p, 0, 0)),
        out_shape=jax.ShapeDtypeStruct((num_parallel, N, N), jnp.float32),
        scratch_shapes=[pltpu.VMEM((N, N), jnp.float32)],
        compiler_params=pltpu.CompilerParams(
            dimension_semantics=("parallel", "arbitrary"),
            vmem_limit_bytes=vmem_limit,
        ),
        cost_estimate=cost,
    )(x_k, w, b)

    if num_parallel == 1:
        return partials[0]
    return jnp.sum(partials, axis=0)


def _reference_forward(x_ncdhw, conv_w, conv_b):
    """Pure-JAX reference of the exact PyTorch semantics (general scatter)."""
    N, C, D, H, W = x_ncdhw.shape
    w = conv_w.reshape(C)
    model_out = jax.nn.sigmoid(
        jnp.einsum("ncdhw,c->ndhw", x_ncdhw, w) + conv_b.reshape(())
    )[:, None]                                               # (N,1,D,H,W)
    out_max = (model_out > 0.6).astype(jnp.int32)[:, 0]      # (N,D,H,W)
    d_idx = jnp.arange(D).reshape(1, D, 1, 1, 1)
    selected = (out_max[:, None] == d_idx).any(axis=2).astype(jnp.float32)
    prod = model_out * selected[None]                        # (N,N,D,H,W)
    return prod.sum(axis=(2, 3, 4))                          # (N,N)


if __name__ == "__main__":
    N, C, D, H, W = 2, 4, 8, 16, 16
    key = jax.random.PRNGKey(0)
    kx, kw, kb = jax.random.split(key, 3)
    x = jax.random.normal(kx, (N, C, D, H, W), dtype=jnp.float32)
    conv_w = 0.5 * jax.random.normal(kw, (C,), dtype=jnp.float32)
    conv_b = 0.1 * jax.random.normal(kb, (1,), dtype=jnp.float32)

    ref = _reference_forward(x, conv_w, conv_b)

    # Default (device-derived) tiling.
    out = jax.block_until_ready(model_wrapper_forward(x, conv_w, conv_b))
    assert out.shape == (N, N), out.shape
    assert jnp.allclose(out, ref, rtol=1e-4, atol=1e-4), (out, ref)

    # Exercise the 2-way leading-split path (2 shards x 1 V-tile each;
    # on single-TensorCore chips this is just a serial loop but stays correct).
    out2 = jax.block_until_ready(
        model_wrapper_forward(x, conv_w, conv_b, tile_v=128, num_parallel=2))
    assert jnp.allclose(out2, ref, rtol=1e-4, atol=1e-4), (out2, ref)

    # Exercise the V-accumulation path (1 shard x 2 V-tiles, scratch acc).
    out3 = jax.block_until_ready(
        model_wrapper_forward(x, conv_w, conv_b, tile_v=128, num_parallel=1))
    assert jnp.allclose(out3, ref, rtol=1e-4, atol=1e-4), (out3, ref)

    # Irregular spatial size: exercises V zero-padding + in-kernel tail mask.
    H2 = W2 = 18
    x2 = jax.random.normal(kx, (N, C, D, H2, W2), dtype=jnp.float32)
    ref2 = _reference_forward(x2, conv_w, conv_b)
    out4 = jax.block_until_ready(model_wrapper_forward(x2, conv_w, conv_b))
    assert jnp.allclose(out4, ref2, rtol=1e-4, atol=1e-4), (out4, ref2)

    print("KERNEL_OK")
</pallas_src>

<mosaic_0001>
module attributes {stable_mosaic.version = 11 : i64} {
  func.func @kernel(%arg0: i32, %arg1: i32, %arg2: memref<2x4x8x256xf32, #tpu.memory_space<vmem>>, %arg3: memref<4xf32, #tpu.memory_space<smem>>, %arg4: memref<1xf32, #tpu.memory_space<smem>>, %arg5: memref<1x2x2xf32, #tpu.memory_space<vmem>>, %arg6: memref<2x2xf32, #tpu.memory_space<vmem>>) attributes {dimension_semantics = [#tpu.dimension_semantics<parallel>, #tpu.dimension_semantics<arbitrary>], iteration_bounds = array<i64: 1, 1>, scalar_prefetch = 0 : i64, scratch_operands = 1 : i64, tpu.core_type = #tpu.core_type<tc>, window_params = [{transform_indices = @transform_0, window_bounds = array<i64: 2, 4, 8, 256>}, {transform_indices = @transform_1, window_bounds = array<i64: 4>}, {transform_indices = @transform_2, window_bounds = array<i64: 1>}, {transform_indices = @transform_3, window_bounds = array<i64: 1, 2, 2>}]} {
    %c0_i32 = arith.constant 0 : i32
    %0 = arith.cmpi eq, %arg1, %c0_i32 : i32
    %1 = arith.extui %0 : i1 to i32
    %c0_i32_0 = arith.constant 0 : i32
    %2 = arith.cmpi ne, %1, %c0_i32_0 : i32
    scf.if %2 {
      %cst_31 = arith.constant 0.000000e+00 : f32
      %62 = vector.broadcast %cst_31 : f32 to vector<2x2xf32>
      %c0_32 = arith.constant 0 : index
      %c0_33 = arith.constant 0 : index
      %63 = vector.load %arg6[%c0_32, %c0_33] : memref<2x2xf32, #tpu.memory_space<vmem>>, vector<2x2xf32>
      tpu.vector_store %arg6[%c0_32, %c0_33], %62 {strides = array<i32>} : memref<2x2xf32, #tpu.memory_space<vmem>>, vector<2x2xf32>,
    } else {
    }
    %c0 = arith.constant 0 : index
    %c0_1 = arith.constant 0 : index
    %c0_2 = arith.constant 0 : index
    %c0_3 = arith.constant 0 : index
    %3 = vector.load %arg2[%c0, %c0_1, %c0_2, %c0_3] : memref<2x4x8x256xf32, #tpu.memory_space<vmem>>, vector<2x1x8x256xf32>
    %4 = vector.shape_cast %3 : vector<2x1x8x256xf32> to vector<2x8x256xf32>
    %c0_4 = arith.constant 0 : index
    %5 = memref.load %arg3[%c0_4] : memref<4xf32, #tpu.memory_space<smem>>
    %6 = vector.broadcast %5 : f32 to vector<2x8x256xf32>
    %7 = arith.mulf %4, %6 : vector<2x8x256xf32>
    %c0_5 = arith.constant 0 : index
    %c1 = arith.constant 1 : index
    %c0_6 = arith.constant 0 : index
    %c0_7 = arith.constant 0 : index
    %8 = vector.load %arg2[%c0_5, %c1, %c0_6, %c0_7] : memref<2x4x8x256xf32, #tpu.memory_space<vmem>>, vector<2x1x8x256xf32>
    %9 = vector.shape_cast %8 : vector<2x1x8x256xf32> to vector<2x8x256xf32>
    %c1_8 = arith.constant 1 : index
    %10 = memref.load %arg3[%c1_8] : memref<4xf32, #tpu.memory_space<smem>>
    %11 = vector.broadcast %10 : f32 to vector<2x8x256xf32>
    %12 = arith.mulf %9, %11 : vector<2x8x256xf32>
    %c0_9 = arith.constant 0 : index
    %c2 = arith.constant 2 : index
    %c0_10 = arith.constant 0 : index
    %c0_11 = arith.constant 0 : index
    %13 = vector.load %arg2[%c0_9, %c2, %c0_10, %c0_11] : memref<2x4x8x256xf32, #tpu.memory_space<vmem>>, vector<2x1x8x256xf32>
    %14 = vector.shape_cast %13 : vector<2x1x8x256xf32> to vector<2x8x256xf32>
    %c2_12 = arith.constant 2 : index
    %15 = memref.load %arg3[%c2_12] : memref<4xf32, #tpu.memory_space<smem>>
    %16 = vector.broadcast %15 : f32 to vector<2x8x256xf32>
    %17 = arith.mulf %14, %16 : vector<2x8x256xf32>
    %c0_13 = arith.constant 0 : index
    %c3 = arith.constant 3 : index
    %c0_14 = arith.constant 0 : index
    %c0_15 = arith.constant 0 : index
    %18 = vector.load %arg2[%c0_13, %c3, %c0_14, %c0_15] : memref<2x4x8x256xf32, #tpu.memory_space<vmem>>, vector<2x1x8x256xf32>
    %19 = vector.shape_cast %18 : vector<2x1x8x256xf32> to vector<2x8x256xf32>
    %c3_16 = arith.constant 3 : index
    %20 = memref.load %arg3[%c3_16] : memref<4xf32, #tpu.memory_space<smem>>
    %21 = vector.broadcast %20 : f32 to vector<2x8x256xf32>
    %22 = arith.mulf %19, %21 : vector<2x8x256xf32>
    %23 = arith.addf %7, %12 : vector<2x8x256xf32>
    %24 = arith.addf %17, %22 : vector<2x8x256xf32>
    %25 = arith.addf %23, %24 : vector<2x8x256xf32>
    %c0_17 = arith.constant 0 : index
    %26 = memref.load %arg4[%c0_17] : memref<1xf32, #tpu.memory_space<smem>>
    %27 = vector.broadcast %26 : f32 to vector<2x8x256xf32>
    %28 = arith.addf %25, %27 : vector<2x8x256xf32>
    %cst = arith.constant dense<0xFF800000> : vector<2x256xf32>
    %29 = vector.multi_reduction <maximumf>, %28, %cst [1] : vector<2x8x256xf32> to vector<2x256xf32>
    %cst_18 = arith.constant 0.405465096 : f32
    %30 = vector.broadcast %cst_18 : f32 to vector<2x256xf32>
    %31 = arith.cmpf ogt, %29, %30 : vector<2x256xf32>
    %32 = arith.extui %31 : vector<2x256xi1> to vector<2x256xi32>
    %33 = arith.sitofp %32 : vector<2x256xi32> to vector<2x256xf32>
    %cst_19 = arith.constant dense<0x7F800000> : vector<2x256xf32>
    %34 = vector.multi_reduction <minimumf>, %28, %cst_19 [1] : vector<2x8x256xf32> to vector<2x256xf32>
    %cst_20 = arith.constant 0.405465096 : f32
    %35 = vector.broadcast %cst_20 : f32 to vector<2x256xf32>
    %36 = arith.cmpf ole, %34, %35 : vector<2x256xf32>
    %37 = arith.extui %36 : vector<2x256xi1> to vector<2x256xi32>
    %38 = arith.sitofp %37 : vector<2x256xi32> to vector<2x256xf32>
    %39 = vector.extract_strided_slice %28 {offsets = [0, 0, 0], sizes = [2, 1, 256], strides = [1, 1, 1]} : vector<2x8x256xf32> to vector<2x1x256xf32>
    %40 = vector.shape_cast %39 : vector<2x1x256xf32> to vector<2x256xf32>
    %41 = arith.negf %40 : vector<2x256xf32>
    %42 = math.exp %41 : vector<2x256xf32>
    %cst_21 = arith.constant 1.000000e+00 : f32
    %43 = vector.broadcast %cst_21 : f32 to vector<2x256xf32>
    %44 = arith.addf %43, %42 : vector<2x256xf32>
    %45 = arith.divf %43, %44 : vector<2x256xf32>
    %46 = vector.extract_strided_slice %28 {offsets = [0, 1, 0], sizes = [2, 1, 256], strides = [1, 1, 1]} : vector<2x8x256xf32> to vector<2x1x256xf32>
    %47 = vector.shape_cast %46 : vector<2x1x256xf32> to vector<2x256xf32>
    %48 = arith.negf %47 : vector<2x256xf32>
    %49 = math.exp %48 : vector<2x256xf32>
    %cst_22 = arith.constant 1.000000e+00 : f32
    %50 = vector.broadcast %cst_22 : f32 to vector<2x256xf32>
    %51 = arith.addf %50, %49 : vector<2x256xf32>
    %52 = arith.divf %50, %51 : vector<2x256xf32>
    %cst_23 = arith.constant dense<0.000000e+00> : vector<2x2xf32>
    %53 = tpu.matmul %45, %38, %cst_23 {dimension_numbers = #tpu.dot_dimension_numbers<[1], [1], [0], [0], [0, 0, 1, 0], [], []>} : vector<2x256xf32>, vector<2x256xf32>, vector<2x2xf32> -> vector<2x2xf32>
    %cst_24 = arith.constant dense<0.000000e+00> : vector<2x2xf32>
    %54 = tpu.matmul %52, %33, %cst_24 {dimension_numbers = #tpu.dot_dimension_numbers<[1], [1], [0], [0], [0, 0, 1, 0], [], []>} : vector<2x256xf32>, vector<2x256xf32>, vector<2x2xf32> -> vector<2x2xf32>
    %55 = arith.addf %53, %54 : vector<2x2xf32>
    %c0_25 = arith.constant 0 : index
    %c0_26 = arith.constant 0 : index
    %56 = vector.load %arg6[%c0_25, %c0_26] : memref<2x2xf32, #tpu.memory_space<vmem>>, vector<2x2xf32>
    %57 = arith.addf %56, %55 : vector<2x2xf32>
    %c0_27 = arith.constant 0 : index
    %c0_28 = arith.constant 0 : index
    %58 = vector.load %arg6[%c0_27, %c0_28] : memref<2x2xf32, #tpu.memory_space<vmem>>, vector<2x2xf32>
    tpu.vector_store %arg6[%c0_27, %c0_28], %57 {strides = array<i32>} : memref<2x2xf32, #tpu.memory_space<vmem>>, vector<2x2xf32>,
    %c0_i32_29 = arith.constant 0 : i32
    %59 = arith.cmpi eq, %arg1, %c0_i32_29 : i32
    %60 = arith.extui %59 : i1 to i32
    %c0_i32_30 = arith.constant 0 : i32
    %61 = arith.cmpi ne, %60, %c0_i32_30 : i32
    scf.if %61 {
      %c0_31 = arith.constant 0 : index
      %c0_32 = arith.constant 0 : index
      %62 = vector.load %arg6[%c0_31, %c0_32] : memref<2x2xf32, #tpu.memory_space<vmem>>, vector<2x2xf32>
      %63 = vector.shape_cast %62 : vector<2x2xf32> to vector<1x2x2xf32>
      %c0_33 = arith.constant 0 : index
      %c0_34 = arith.constant 0 : index
      %c0_35 = arith.constant 0 : index
      %64 = vector.load %arg5[%c0_33, %c0_34, %c0_35] : memref<1x2x2xf32, #tpu.memory_space<vmem>>, vector<1x2x2xf32>
      tpu.vector_store %arg5[%c0_33, %c0_34, %c0_35], %63 {strides = array<i32>} : memref<1x2x2xf32, #tpu.memory_space<vmem>>, vector<1x2x2xf32>,
    } else {
    }
    return
  }
  func.func @transform_0(%arg0: i32, %arg1: i32) -> (i32, i32, i32, i32) {
    %c1_i32 = arith.constant 1 : i32
    %0 = arith.muli %arg0, %c1_i32 : i32
    %1 = arith.addi %0, %arg1 : i32
    %c0_i32 = arith.constant 0 : i32
    %c0_i32_0 = arith.constant 0 : i32
    %c0_i32_1 = arith.constant 0 : i32
    %c0_i32_2 = arith.constant 0 : i32
    return %c0_i32, %c0_i32_0, %c0_i32_1, %1 : i32, i32, i32, i32
  }
  func.func @transform_1(%arg0: i32, %arg1: i32) -> i32 {
    %c0_i32 = arith.constant 0 : i32
    %c0_i32_0 = arith.constant 0 : i32
    return %c0_i32 : i32
  }
  func.func @transform_2(%arg0: i32, %arg1: i32) -> i32 {
    %c0_i32 = arith.constant 0 : i32
    %c0_i32_0 = arith.constant 0 : i32
    return %c0_i32 : i32
  }
  func.func @transform_3(%arg0: i32, %arg1: i32) -> (i32, i32, i32) {
    %c0_i32 = arith.constant 0 : i32
    %c0_i32_0 = arith.constant 0 : i32
    %c0_i32_1 = arith.constant 0 : i32
    return %arg0, %c0_i32, %c0_i32_0 : i32, i32, i32
  }
}

</mosaic_0001>

<bundles_post_ra>
// kernel: tpu_custom_call.1
= control target key start
LH: loop header
LB: loop body
LE: loop exit
PB: predicated region body
PF: predicated region fallthrough
CT: control target
= control target key end

     0   :  { %9 = vsyncpa [#allocation5], 0  ;;  %s597_s0 = inlined_call_operand.hbm [shape: f32[2,4,8,256], index: 0, kind: input, shape index: {}]   ;;  %s598_s1 = inlined_call_operand.vmem [shape: f32[4], index: 1, kind: input, shape index: {}]   ;;  %s599_s2 = inlined_call_operand.<no memory space> [shape: f32[1], index: 2, kind: input, shape index: {}]   ;;  %s600_s3 = inlined_call_operand.hbm [shape: f32[1,2,2], index: 3, kind: output, shape index: {}]  }
   0x1   :  { %10 = vsyncpa [#allocation7], 0 }
   0x2   :  { %11 = vsyncpa [#allocation6], 0  ;;  %s20_s14 = sshll.u32 %s597_s0, 4  ;;  %s509_s15 = smov [#allocation4]   ;;  %s21_s14 = int_to_ptr.hbm [resolvable:$true] %s20_s14 }
   0x3   :  { %s22_s16 = sshll.u32 %s509_s15, 4  ;;  %s34_s19 = sshll.u32 %s598_s1, 4  ;;  %s23_s16 = int_to_ptr.vmem [resolvable:$true] %s22_s16  ;;  %s35_s19 = int_to_ptr.vmem [resolvable:$true] %s34_s19 }
   0x4   :  { %s510_s20 = smov 256   ;;  %s511_s21 = smov 16  }
   0x5   :  { %28 = dma.hbm_to_vmem [thread:$0]  %s21_s14, 2048, %s23_s16, [#allocation5], %s510_s20, %s510_s20, %s511_s21  }
   0x6   :  { %s512_s22 = smov [#allocation8]  }
   0x7   :  { %37 = dma.vmem_to_smem %s35_s19, 16, %s512_s22, [#allocation7]  }
   0x8   :  { %503 = dma.done.wait [#allocation5], 2048  }
   0x9   :  { %504 = vsyncadd [#allocation5], 4294965248 }
   0xa   :  { %505 = dma.done.wait [#allocation7], 16  }
   0xb   :  { %506 = vsyncadd [#allocation7], 4294967280 }
   0xc   :  { %48 = sfence }
   0xd   :  { %s61_s0 = sld [smem:[#allocation8]]  ;;  %v57_v0 = vld [vmem:[#allocation4] sm:$0xff]  ;;  %v58_v2 = vld [vmem:[#allocation4 + $0x8] sm:$0xff]  ;;  %v68_v3 = vld [vmem:[#allocation4 + $0x10] sm:$0xff]  ;;  %v113_v41 = vstv %s599_s2  ;;  %vm271_vm0 = vcmask 1041409   ;;  %s514_s2 = smov [#allocation9]  }
   0xe   :  { %s406_s23 = sld [smem:[#allocation8 + $0x1]]  ;;  %v59_v1 = vld [vmem:[#allocation4 + $0x40] sm:$0xff]  ;;  %v70_v4 = vld [vmem:[#allocation4 + $0x50] sm:$0xff]  ;;  %v60_v5 = vld [vmem:[#allocation4 + $0x48] sm:$0xff]  ;;  %s393_s27 = sshll.u32 %s514_s2, 4  ;;  %s394_s27 = int_to_ptr.vmem [resolvable:$true] %s393_s27 }
   0xf   :  { %s407_s24 = sld [smem:[#allocation8 + $0x2]]  ;;  %v79_v7 = vld [vmem:[#allocation4 + $0x20] sm:$0xff]  ;;  %v69_v9 = vld [vmem:[#allocation4 + $0x18] sm:$0xff]  ;;  %v90_v13 = vld [vmem:[#allocation4 + $0x30] sm:$0xff]  ;;  %s395_s30 = sshll.u32 %s600_s3, 4  ;;  %s396_s30 = int_to_ptr.hbm [resolvable:$true] %s395_s30 }
  0x10   :  { %s408_s25 = sld [smem:[#allocation8 + $0x3]]  ;;  %v81_v8 = vld [vmem:[#allocation4 + $0x60] sm:$0xff]  ;;  %v92_v14 = vld [vmem:[#allocation4 + $0x70] sm:$0xff]  ;;  %v71_v16 = vld [vmem:[#allocation4 + $0x58] sm:$0xff] }
  0x11   :  { %v80_v21 = vld [vmem:[#allocation4 + $0x28] sm:$0xff]  ;;  %v91_v23 = vld [vmem:[#allocation4 + $0x38] sm:$0xff] }
  0x12   :  { %v82_v22 = vld [vmem:[#allocation4 + $0x68] sm:$0xff]  ;;  %v93_v28 = vld [vmem:[#allocation4 + $0x78] sm:$0xff] }
  0x13   :  { %v62_v6 = vstv %s61_s0 }
  0x14   :  { %v63_v10 = vmul.f32 %v62_v6, %v57_v0  ;;  %v65_v11 = vmul.f32 %v62_v6, %v59_v1  ;;  %v73_v12 = vstv %s406_s23  ;;  %v64_v15 = vmul.f32 %v62_v6, %v58_v2 }
  0x15   :  { %v74_v17 = vmul.f32 %v73_v12, %v68_v3  ;;  %v76_v18 = vmul.f32 %v73_v12, %v70_v4  ;;  %v84_v19 = vstv %s407_s24  ;;  %v66_v20 = vmul.f32 %v62_v6, %v60_v5 }
  0x16   :  { %v85_v24 = vmul.f32 %v84_v19, %v79_v7  ;;  %v87_v25 = vmul.f32 %v84_v19, %v81_v8  ;;  %v95_v26 = vstv %s408_s25  ;;  %v75_v27 = vmul.f32 %v73_v12, %v69_v9 }
  0x17   :  { %v96_v29 = vmul.f32 %v95_v26, %v90_v13  ;;  %v98_v30 = vmul.f32 %v95_v26, %v92_v14  ;;  %v100_v31 = vadd.f32 %v74_v17, %v63_v10  ;;  %v102_v32 = vadd.f32 %v76_v18, %v65_v11 }
  0x18   :  { %v77_v33 = vmul.f32 %v73_v12, %v71_v16  ;;  %v86_v34 = vmul.f32 %v84_v19, %v80_v21  ;;  %v88_v35 = vmul.f32 %v84_v19, %v82_v22  ;;  %v97_v36 = vmul.f32 %v95_v26, %v91_v23 }
  0x19   :  { %v104_v37 = vadd.f32 %v96_v29, %v85_v24  ;;  %v106_v38 = vadd.f32 %v98_v30, %v87_v25  ;;  %v99_v39 = vmul.f32 %v95_v26, %v93_v28  ;;  %v101_v40 = vadd.f32 %v75_v27, %v64_v15 }
  0x1a   :  { %v103_v42 = vadd.f32 %v77_v33, %v66_v20  ;;  %v105_v43 = vadd.f32 %v97_v36, %v86_v34 }
  0x1b   :  { %v108_v44 = vadd.f32 %v104_v37, %v100_v31  ;;  %v110_v45 = vadd.f32 %v106_v38, %v102_v32  ;;  %v107_v46 = vadd.f32 %v99_v39, %v88_v35  ;;  %v513_v32 = vmov 0.0  }
  0x1c   :  { %v109_v47 = vadd.f32 %v105_v43, %v101_v40 }
  0x1d   :  { %v114_v48 = vadd.f32 %v113_v41, %v108_v44  ;;  %v116_v49 = vadd.f32 %v113_v41, %v110_v45  ;;  %v111_v50 = vadd.f32 %v107_v46, %v103_v42 }
  0x1e   :  { %v115_v51 = vadd.f32 %v113_v41, %v109_v47 }
  0x1f   :  { %v118_v52 = vrot.slane %v114_v48, 4  ;;  %v130_v53 = vrot.slane %v116_v49, 4  ;;  %v544_v54 = vadd.f32 %v113_v41, %v111_v50  ;;  %v417_v55 = vmul.f32 -1.442695, %v114_v48 }
  0x20   :  { %v124_v56 = vrot.slane %v115_v51, 4  ;;  %v419_v57 = vmul.f32 -1.442695, %v116_v49  ;;  %v418_v22 = vmul.f32 -1.442695, %v115_v51 }
  0x21   :  { %v155_v58 = vmin.f32 %v114_v48, %v118_v52  ;;  %v167_v59 = vmin.f32 %v116_v49, %v130_v53  ;;  %v136_v60 = vrot.slane %v544_v54, 4  ;;  %427 = vpow2.f32 %v417_v55 }
  0x22   :  { %v161_v61 = vmin.f32 %v115_v51, %v124_v56  ;;  %429 = vpow2.f32 %v419_v57  ;;  %v119_v62 = vmax.f32 %v114_v48, %v118_v52  ;;  %v131_v63 = vmax.f32 %v116_v49, %v130_v53 }
  0x23   :  { %v156_v0 = vrot.slane %v155_v58, 2  ;;  %v168_v1 = vrot.slane %v167_v59, 2  ;;  %v173_v2 = vmin.f32 %v544_v54, %v136_v60  ;;  %v125_v6 = vmax.f32 %v115_v51, %v124_v56 }
  0x24   :  { %v162_v3 = vrot.slane %v161_v61, 2  ;;  %v120_v4 = vrot.slane %v119_v62, 2  ;;  %v132_v5 = vrot.slane %v131_v63, 2  ;;  %v137_v10 = vmax.f32 %v544_v54, %v136_v60 }
  0x25   :  { %v157_v7 = vmin.f32 %v155_v58, %v156_v0  ;;  %v169_v8 = vmin.f32 %v167_v59, %v168_v1  ;;  %v174_v9 = vrot.slane %v173_v2, 2  ;;  %v126_v21 = vrot.slane %v125_v6, 2 }
  0x26   :  { %v163_v11 = vmin.f32 %v161_v61, %v162_v3  ;;  %v121_v12 = vmax.f32 %v119_v62, %v120_v4  ;;  %v133_v17 = vmax.f32 %v131_v63, %v132_v5  ;;  %v138_v26 = vrot.slane %v137_v10, 2 }
  0x27   :  { %v428_v13 = vpop.eup %427  ;;  %v158_v14 = vrot.slane %v157_v7, 1  ;;  %v170_v15 = vrot.slane %v169_v8, 1  ;;  %v175_v16 = vmin.f32 %v173_v2, %v174_v9  ;;  %v127_v35 = vmax.f32 %v125_v6, %v126_v21 }
  0x28   :  { %v430_v18 = vpop.eup %429  ;;  %v164_v19 = vrot.slane %v163_v11, 1  ;;  %v549_v20 = vadd.f32 1.0, %v428_v13  ;;  %v122_v29 = vrot.slane %v121_v12, 1  ;;  %v134_v31 = vrot.slane %v133_v17, 1 }
  0x29   :  { %v159_v23 = vmin.f32 %v157_v7, %v158_v14  ;;  %v171_v24 = vmin.f32 %v169_v8, %v170_v15  ;;  %v176_v25 = vrot.slane %v175_v16, 1  ;;  %v551_v28 = vadd.f32 1.0, %v430_v18 }
  0x2a   :  { %v165_v27 = vmin.f32 %v163_v11, %v164_v19  ;;  %431 = vrcp.f32 %v549_v20  ;;  %v217_v38 = vand.u32 2147483648, %v549_v20  ;;  %v123_v41 = vmax.f32 %v121_v12, %v122_v29 }
  0x2b   :  { %vm178_vm1 = vcmp.le.f32.partialorder %v159_v23, 0.4054651  ;;  %vm180_vm2 = vcmp.le.f32.partialorder %v171_v24, 0.4054651  ;;  %v177_v30 = vmin.f32 %v175_v16, %v176_v25  ;;  %433 = vrcp.f32 %v551_v28 }
  0x2c   :  { %v413_v33 = vsel %vm178_vm1, 1.0, %v513_v32  ;;  %v415_v34 = vsel %vm180_vm2, 1.0, %v513_v32  ;;  %vm179_vm3 = vcmp.le.f32.partialorder %v165_v27, 0.4054651  ;;  %v135_v42 = vmax.f32 %v133_v17, %v134_v31 }
  0x2d   :  { %v335_v36 = vsel %vm271_vm0, %v415_v34, %v413_v33  ;;  %vm181_vm4 = vcmp.le.f32.partialorder %v177_v30, 0.4054651  ;;  %v414_v37 = vsel %vm179_vm3, 1.0, %v513_v32  ;;  %vm211_vm5 = vweird.f32 %v549_v20 }
  0x2e   :  { %354 = vmatpush.xpose.msra.mxu2 %v335_v36  ;;  %v416_v39 = vsel %vm181_vm4, 1.0, %v513_v32  ;;  %v128_v44 = vrot.slane %v127_v35, 1  ;;  %v139_v45 = vmax.f32 %v137_v10, %v138_v26  ;;  %435 = vpow2.f32 %v418_v22 }
  0x2f   :  { %v336_v40 = vsel %vm271_vm0, %v416_v39, %v414_v37  ;;  %v215_v47 = vand.u32 2147483647, %v549_v20  ;;  %v218_v48 = vor.u32 1.1754944e-38, %v217_v38  ;;  %vm142_vm6 = vcmp.gt.f32.partialorder %v123_v41, 0.4054651 }
  0x30   :  { %v432_v43 = vpop.eup %431  ;;  %374 = vmatpush.xpose.msra.mxu3 %v336_v40  ;;  %vm144_vm7 = vcmp.gt.f32.partialorder %v135_v42, 0.4054651  ;;  %v409_v49 = vsel %vm142_vm6, 1.0, %v513_v32  ;;  %v129_v50 = vmax.f32 %v127_v35, %v128_v44  ;;  %v140_v51 = vrot.slane %v139_v45, 1 }
  0x31   :  { %v207_v46 = vmul.f32 %v432_v43, %v549_v20  ;;  %vm212_vm8 = vweird.f32 %v432_v43  ;;  %v411_v53 = vsel %vm144_vm7, 1.0, %v513_v32  ;;  %v420_v55 = vmul.f32 -1.442695, %v544_v54  ;;  %v434_v56 = vpop.eup %433 }
  0x32   :  { %vm241_vm9 = vweird.f32 %v551_v28  ;;  %v281_v57 = vsel %vm271_vm0, %v411_v53, %v409_v49  ;;  %v141_v58 = vmax.f32 %v139_v45, %v140_v51  ;;  %vm143_vm10 = vcmp.gt.f32.partialorder %v129_v50, 0.4054651  ;;  %vm575_vm11 = vmor %vm211_vm5, %vm212_vm8 }
  0x33   :  { %v208_v52 = vsub.f32 1.0, %v207_v46  ;;  %v237_v60 = vmul.f32 %v434_v56, %v551_v28  ;;  %v245_v61 = vand.u32 2147483647, %v551_v28  ;;  %300 = vmatpush.xpose.msra.mxu0 %v281_v57  ;;  %v410_v62 = vsel %vm143_vm10, 1.0, %v513_v32 }
  0x34   :  { %v436_v63 = vpop.eup %435  ;;  %vm242_vm12 = vweird.f32 %v434_v56  ;;  %v247_v0 = vand.u32 2147483648, %v551_v28  ;;  %vm145_vm13 = vcmp.gt.f32.partialorder %v141_v58, 0.4054651  ;;  %437 = vpow2.f32 %v420_v55 }
  0x35   :  { %v209_v59 = vmul.f32 %v432_v43, %v208_v52  ;;  %v238_v2 = vsub.f32 1.0, %v237_v60  ;;  %v412_v3 = vsel %vm145_vm13, 1.0, %v513_v32  ;;  %v203_v4 = vadd.f32 1.0, %v436_v63  ;;  %vm243_vm15 = vmor %vm241_vm9, %vm242_vm12 }
  0x36   :  { %vm216_vm14 = vcmp.eq.f32.partialorder %v215_v47, 8.507059e+37  ;;  %v282_v5 = vsel %vm271_vm0, %v412_v3, %v410_v62  ;;  %v248_v8 = vor.u32 1.1754944e-38, %v247_v0  ;;  %vm246_vm1 = vcmp.eq.f32.partialorder %v245_v61, 8.507059e+37 }
  0x37   :  { %v210_v1 = vadd.f32 %v432_v43, %v209_v59  ;;  %v239_v7 = vmul.f32 %v434_v56, %v238_v2  ;;  %320 = vmatpush.xpose.msra.mxu1 %v282_v5  ;;  %439 = vrcp.f32 %v203_v4  ;;  %v232_v21 = vand.u32 2147483648, %v203_v4 }
  0x38   :  { %vm226_vm2 = vweird.f32 %v203_v4  ;;  %v230_v23 = vand.u32 2147483647, %v203_v4  ;;  %vm55_vm10 = vcmask 9216  }
  0x39   :  { %v214_v6 = vsel %vm575_vm11, %v432_v43, %v210_v1  ;;  %v240_v10 = vadd.f32 %v434_v56, %v239_v7  ;;  %v233_v26 = vor.u32 1.1754944e-38, %v232_v21  ;;  %56 = vst.msk [vmem:[#allocation2] sm:$0x3] %vm55_vm10, %v513_v32 }
  0x3a   :  { %v219_v9 = vsel %vm216_vm14, %v218_v48, %v214_v6  ;;  %v438_v11 = vpop.eup %437  ;;  %vm231_vm5 = vcmp.eq.f32.partialorder %v230_v23, 8.507059e+37 }
  0x3b   :  { %v270_v12 = vrot.slane %v219_v9, 1  ;;  %v244_v13 = vsel %vm243_vm15, %v434_v56, %v240_v10  ;;  %v205_v14 = vadd.f32 1.0, %v438_v11 }
  0x3c   :  { %v249_v15 = vsel %vm246_vm1, %v248_v8, %v244_v13 }
  0x3d   :  { %v440_v16 = vpop.eup %439  ;;  %v325_v17 = vrot.slane %v249_v15, 7  ;;  %441 = vrcp.f32 %v205_v14  ;;  %v272_v19 = vsel %vm271_vm0, %v249_v15, %v270_v12  ;;  %vm256_vm6 = vweird.f32 %v205_v14 }
  0x3e   :  { %v222_v18 = vmul.f32 %v440_v16, %v203_v4  ;;  %301 = vmatmul.f32.vlgmr.msra.gmra.mxu0 %v272_v19  ;;  %vm227_vm3 = vweird.f32 %v440_v16  ;;  %v262_v29 = vand.u32 2147483648, %v205_v14  ;;  %v260_v33 = vand.u32 2147483647, %v205_v14 }
  0x3f   :  { %v326_v20 = vsel %vm271_vm0, %v325_v17, %v219_v9  ;;  %vm228_vm4 = vmor %vm226_vm2, %vm227_vm3 }
  0x40   :  { %355 = vmatmul.f32.vlgmr.msra.gmra.mxu2 %v326_v20  ;;  %v223_v22 = vsub.f32 1.0, %v222_v18  ;;  %v263_v36 = vor.u32 1.1754944e-38, %v262_v29  ;;  %vm261_vm9 = vcmp.eq.f32.partialorder %v260_v33, 8.507059e+37  ;;  %v379_v50 = vld [vmem:[#allocation2] sm:$0x3] }
  0x42   :  { %v224_v24 = vmul.f32 %v440_v16, %v223_v22 }
  0x43   :  { %v442_v25 = vpop.eup %441 }
  0x44   :  { %v225_v27 = vadd.f32 %v440_v16, %v224_v24  ;;  %v252_v28 = vmul.f32 %v442_v25, %v205_v14  ;;  %vm257_vm7 = vweird.f32 %v442_v25 }
  0x45   :  { %vm258_vm8 = vmor %vm256_vm6, %vm257_vm7 }
  0x46   :  { %v229_v30 = vsel %vm228_vm4, %v440_v16, %v225_v27  ;;  %v253_v31 = vsub.f32 1.0, %v252_v28 }
  0x47   :  { %v234_v34 = vsel %vm231_vm5, %v233_v26, %v229_v30 }
  0x48   :  { %v254_v35 = vmul.f32 %v442_v25, %v253_v31  ;;  %v273_v38 = vrot.slane %v234_v34, 1 }
  0x4a   :  { %v255_v37 = vadd.f32 %v442_v25, %v254_v35 }
  0x4c   :  { %v259_v39 = vsel %vm258_vm8, %v442_v25, %v255_v37 }
  0x4d   :  { %v264_v40 = vsel %vm261_vm9, %v263_v36, %v259_v39 }
  0x4e   :  { %v327_v41 = vrot.slane %v264_v40, 7  ;;  %v274_v42 = vsel %vm271_vm0, %v264_v40, %v273_v38 }
  0x4f   :  { %321 = vmatmul.f32.vlgmr.msra.gmra.mxu1 %v274_v42 }
  0x50   :  { %v328_v43 = vsel %vm271_vm0, %v327_v41, %v234_v34 }
  0x51   :  { %375 = vmatmul.f32.vlgmr.msra.gmra.mxu3 %v328_v43 }
  0xbb   :  { %v302_v44 = vpop.f32.mrf.mxu0 }
  0xc3   :  { %v356_v47 = vpop.f32.mrf.mxu2 }
  0xcc   :  { %v322_v45 = vpop.f32.mrf.mxu1 }
  0xcd   :  { %v323_v46 = vadd.f32 %v322_v45, %v302_v44 }
  0xcf   :  { %v357_v48 = vadd.f32 %v356_v47, %v323_v46 }
  0xd4   :  { %v376_v49 = vpop.f32.mrf.mxu3 }
  0xd5   :  { %v377_v51 = vadd.f32 %v376_v49, %v357_v48 }
  0xd7   :  { %v380_v52 = vadd.f32 %v379_v50, %v377_v51 }
  0xd9   :  { %382 = vst.msk [vmem:[#allocation2] sm:$0x3] %vm55_vm10, %v380_v52 }
  0xe0   :  { %v386_v32 = vld [vmem:[#allocation2] sm:$0x3] }
  0xe1   :  { %387 = vst.msk [vmem:[#allocation9] sm:$0x3] %vm55_vm10, %v386_v32 }
  0xe2   :  { %398 = dma.vmem_to_hbm [thread:$0]  %s394_s27, 32, %s396_s30, [#allocation6]  }
  0xe3   :  { %507 = dma.done.wait [#allocation6], 32  }
  0xe4   :  { %508 = vsyncadd [#allocation6], 4294967264 }
  0xe5   :  { %403 = vsyncpa [#allocation5], 1 }
  0xe6   :  { %404 = vsyncpa [#allocation6], 1 }
  0xe7   :  { %405 = vsyncpa [#allocation7], 1 }

</bundles_post_ra>
